<compile_context>
chip_gen: v6e
topology: v6e:2x2x1
jax: 0.10.0
libtpu: 0.0.40
codegen_flags: <defaults>
</compile_context>

<pallas_src>
import functools

import jax
import jax.numpy as jnp
from jax import lax
from jax.experimental import pallas as pl
from jax.experimental.pallas import tpu as pltpu


# ----------------------------- Pallas kernel --------------------------------

def _residual_group_kernel(x_ref, w_ref, o_ref, actp_ref, *, L, C, H, W, LPAD):
    """Fused ResidualGroup for one batch element.

    x_ref    : (1, C, H*W)              input activation, lane dim = H*W (caller dtype)
    w_ref    : (L*9, C, C)              fused per-layer per-tap conv weights,
                                        row block l*9 + (kh*3+kw) = w_fused[:, :, kh, kw]
    o_ref    : (1, C, H*W)              output
    actp_ref : (C, LPAD + H*W + W + 1)  flat zero-padded activation scratch (VMEM),
                                        activation starts at the 128-aligned offset LPAD
    """
    HW = H * W
    RPAD = W + 1
    cdtype = actp_ref.dtype

    # Zero only the two halo pad regions once; the middle [LPAD, LPAD+HW) is rewritten
    # every layer, so the pads stay zero for all layers.
    actp_ref[:, :LPAD] = jnp.zeros((C, LPAD), cdtype)
    actp_ref[:, LPAD + HW:] = jnp.zeros((C, RPAD), cdtype)

    # Horizontal-halo column masks (the vertical halo lands in the zero pads).  Applied
    # to the f32 accumulators of the kw=0 / kw=2 tap groups: the mask broadcasts over the
    # contraction (channel) dim, so mask * dot(W, win) == dot(W, mask * win).
    wpos = lax.broadcasted_iota(jnp.int32, (1, HW), 1) % W
    mask_l = (wpos >= 1).astype(jnp.float32)       # kw=0 reads col w-1 -> invalid at w=0
    mask_r = (wpos <= W - 2).astype(jnp.float32)   # kw=2 reads col w+1 -> invalid at w=W-1

    # Initial activation = input, cast to the compute dtype; lane-aligned store.
    actp_ref[:, LPAD:LPAD + HW] = x_ref[0].astype(cdtype)

    act = None
    for l in range(L):
        if l > 0:
            actp_ref[:, LPAD:LPAD + HW] = act.astype(cdtype)
        # 9 accumulated MXU matmuls (K = C each), grouped by kw so each column mask is
        # applied exactly once per layer, on the f32 accumulator.
        accs = [None, None, None]
        for kh in range(3):
            base = LPAD + (kh - 1) * W
            for kw in range(3):
                win = actp_ref[:, base + kw - 1: base + kw - 1 + HW]     # (C, HW)
                part = jnp.dot(w_ref[l * 9 + kh * 3 + kw], win,
                               preferred_element_type=jnp.float32)
                accs[kw] = part if accs[kw] is None else accs[kw] + part
        act = accs[1] + mask_l * accs[0] + mask_r * accs[2]

    # Residual add + ReLU in f32.  The f32 input is re-read from VMEM here instead of
    # being kept live across the layer loop.
    out = jnp.maximum(act + x_ref[0].astype(jnp.float32), 0.0)
    o_ref[0] = out.astype(o_ref.dtype)


# ------------------------------- wrappers ------------------------------------

def init_residual_group_params(key, n_feat, n_resblocks, dtype=jnp.float32):
    """Deterministic params. Per RCAB: 3x3 OIHW weight and 1x1 OIHW weight (no bias)."""
    params = []
    for _ in range(n_resblocks):
        key, k3, k1 = jax.random.split(key, 3)
        w3 = jax.random.normal(k3, (n_feat, n_feat, 3, 3), dtype) * 0.1   # OIHW
        w1 = jax.random.normal(k1, (n_feat, n_feat, 1, 1), dtype) * 0.1   # OIHW
        params.append((w3, w1))
    return params


def _fuse_rcab_weight_taps(w3_oihw, w1_oihw):
    """W3 + center-pad(W1), rearranged to tap-major (9, C_out, C_in) matmul weights."""
    w1_pad = jnp.pad(w1_oihw, ((0, 0), (0, 0), (1, 1), (1, 1)))
    wf = w3_oihw + w1_pad                                   # (O, I, 3, 3)
    return jnp.transpose(wf, (2, 3, 0, 1)).reshape(9, wf.shape[0], wf.shape[1])


def _vmem_limit_bytes():
    """Generation-aware scoped-VMEM budget: ~3/4 of capacity, capped at 100 MiB
    (≈96 MiB on 128 MiB v5e/v6e, ≈48 MiB on 64 MiB v7x)."""
    try:
        cap = int(pltpu.get_tpu_info().vmem_capacity_bytes)
    except Exception:
        cap = 64 * 1024 * 1024
    return min(cap * 3 // 4, 100 * 1024 * 1024)


def residual_group_forward(x_nchw, params, compute_dtype=jnp.bfloat16):
    """ReLU( RCAB_n(...RCAB_1(x)...) + x ). Input/output NCHW (PyTorch convention)."""
    N, C, H, W = x_nchw.shape
    HW = H * W
    L = len(params)
    LPAD = ((W + 1 + 127) // 128) * 128      # 128-lane-aligned activation start offset

    # (L*9, C, C): layer-major, tap-major fused conv weights, cast to the compute dtype.
    w_all = jnp.concatenate([_fuse_rcab_weight_taps(w3, w1) for (w3, w1) in params],
                            axis=0).astype(compute_dtype)
    x_flat = x_nchw.reshape(N, C, HW)        # lane-dense layout; stays in caller dtype

    kernel = functools.partial(_residual_group_kernel, L=L, C=C, H=H, W=W, LPAD=LPAD)
    out_flat = pl.pallas_call(
        kernel,
        out_shape=jax.ShapeDtypeStruct((N, C, HW), x_nchw.dtype),
        grid_spec=pltpu.PrefetchScalarGridSpec(
            num_scalar_prefetch=0,
            grid=(N,),
            in_specs=[
                pl.BlockSpec((1, C, HW), lambda n: (n, 0, 0)),
                pl.BlockSpec((L * 9, C, C), lambda n: (0, 0, 0)),
            ],
            out_specs=pl.BlockSpec((1, C, HW), lambda n: (n, 0, 0)),
            scratch_shapes=[
                pltpu.VMEM((C, LPAD + HW + W + 1), compute_dtype),   # flat padded act
            ],
        ),
        compiler_params=pltpu.CompilerParams(
            dimension_semantics=("parallel",),
            vmem_limit_bytes=_vmem_limit_bytes(),
        ),
    )(x_flat, w_all)
    return out_flat.reshape(N, C, H, W)


# ------------------------------ reference ------------------------------------

def _reference_forward(x_nchw, params):
    """Plain-JAX reference mirroring the PyTorch module (NCHW convs)."""
    dn = lax.conv_dimension_numbers(x_nchw.shape, params[0][0].shape,
                                    ("NCHW", "OIHW", "NCHW"))
    res = x_nchw
    for (w3, w1) in params:
        c3 = lax.conv_general_dilated(res, w3, (1, 1), ((1, 1), (1, 1)),
                                      dimension_numbers=dn)
        c1 = lax.conv_general_dilated(res, w1, (1, 1), ((0, 0), (0, 0)),
                                      dimension_numbers=dn)
        res = c3 + c1
    return jnp.maximum(res + x_nchw, 0.0)


# --------------------------------- main ---------------------------------------

if __name__ == "__main__":
    key = jax.random.PRNGKey(0)
    kx, kp = jax.random.split(key)

    N, C, H, W = 2, 4, 16, 16          # small shapes; C = n_feat
    n_resblocks = 2

    x = jax.random.normal(kx, (N, C, H, W), jnp.float32)
    params = init_residual_group_params(kp, n_feat=C, n_resblocks=n_resblocks)

    ref = _reference_forward(x, params)

    # f32 compute path: tight match to the reference.
    out_f32 = jax.block_until_ready(
        residual_group_forward(x, params, compute_dtype=jnp.float32))
    assert out_f32.shape == (N, C, H, W)
    assert jnp.allclose(out_f32, ref, atol=1e-4, rtol=1e-4), "f32 mismatch vs reference"

    # Default bf16 compute path (bf16 scratch/MXU inputs, f32 accumulation, f32 residual).
    out_bf16 = jax.block_until_ready(residual_group_forward(x, params))
    assert jnp.allclose(out_bf16, ref, atol=5e-2, rtol=5e-2), "bf16 mismatch vs reference"

    print("KERNEL_OK")
</pallas_src>

<mosaic_0001>
module attributes {stable_mosaic.version = 11 : i64} {
  func.func @_residual_group_kernel(%arg0: i32, %arg1: memref<1x4x256xf32, #tpu.memory_space<vmem>>, %arg2: memref<18x4x4xf32, #tpu.memory_space<vmem>>, %arg3: memref<1x4x256xf32, #tpu.memory_space<vmem>>, %arg4: memref<4x401xf32, #tpu.memory_space<vmem>>) attributes {dimension_semantics = [#tpu.dimension_semantics<parallel>], iteration_bounds = array<i64: 2>, scalar_prefetch = 0 : i64, scratch_operands = 1 : i64, tpu.core_type = #tpu.core_type<tc>, window_params = [{transform_indices = @transform_0, window_bounds = array<i64: 1, 4, 256>}, {pipeline_mode = #tpu.pipeline_mode<synchronous>, transform_indices = @transform_1, window_bounds = array<i64: 18, 4, 4>}, {transform_indices = @transform_2, window_bounds = array<i64: 1, 4, 256>}]} {
    %cst = arith.constant 0.000000e+00 : f32
    %0 = vector.broadcast %cst : f32 to vector<4x128xf32>
    %c0 = arith.constant 0 : index
    %c0_0 = arith.constant 0 : index
    %1 = vector.load %arg4[%c0, %c0_0] : memref<4x401xf32, #tpu.memory_space<vmem>>, vector<4x128xf32>
    tpu.vector_store %arg4[%c0, %c0_0], %0 {strides = array<i32>} : memref<4x401xf32, #tpu.memory_space<vmem>>, vector<4x128xf32>,
    %cst_1 = arith.constant 0.000000e+00 : f32
    %2 = vector.broadcast %cst_1 : f32 to vector<4x17xf32>
    %c0_2 = arith.constant 0 : index
    %c384 = arith.constant 384 : index
    %3 = vector.load %arg4[%c0_2, %c384] : memref<4x401xf32, #tpu.memory_space<vmem>>, vector<4x17xf32>
    tpu.vector_store %arg4[%c0_2, %c384], %2 {strides = array<i32>} : memref<4x401xf32, #tpu.memory_space<vmem>>, vector<4x17xf32>,
    %4 = tpu.iota {dimensions = array<i32: 1>} : vector<1x256xi32>
    %c16_i32 = arith.constant 16 : i32
    %c0_i32 = arith.constant 0 : i32
    %5 = arith.cmpi eq, %c16_i32, %c0_i32 : i32
    %c1_i32 = arith.constant 1 : i32
    %6 = arith.select %5, %c1_i32, %c16_i32 : i32
    %7 = vector.broadcast %6 : i32 to vector<1x256xi32>
    %8 = arith.remsi %4, %7 : vector<1x256xi32>
    %c0_i32_3 = arith.constant 0 : i32
    %9 = vector.broadcast %c0_i32_3 : i32 to vector<1x256xi32>
    %10 = arith.cmpi ne, %8, %9 : vector<1x256xi32>
    %c0_i32_4 = arith.constant 0 : i32
    %11 = vector.broadcast %c0_i32_4 : i32 to vector<1x256xi32>
    %12 = arith.cmpi slt, %8, %11 : vector<1x256xi32>
    %c0_i32_5 = arith.constant 0 : i32
    %13 = arith.cmpi slt, %6, %c0_i32_5 : i32
    %14 = vector.broadcast %13 : i1 to vector<1x256xi1>
    %15 = vector.broadcast %14 : vector<1x256xi1> to vector<1x256xi1>
    %16 = arith.xori %12, %15 : vector<1x256xi1>
    %17 = arith.andi %16, %10 : vector<1x256xi1>
    %18 = vector.broadcast %6 : i32 to vector<1x256xi32>
    %19 = arith.addi %8, %18 : vector<1x256xi32>
    %20 = arith.select %17, %19, %8 : vector<1x256xi1>, vector<1x256xi32>
    %c1_i32_6 = arith.constant 1 : i32
    %21 = vector.broadcast %c1_i32_6 : i32 to vector<1x256xi32>
    %22 = arith.cmpi sge, %20, %21 : vector<1x256xi32>
    %23 = arith.extui %22 : vector<1x256xi1> to vector<1x256xi32>
    %24 = arith.sitofp %23 : vector<1x256xi32> to vector<1x256xf32>
    %c14_i32 = arith.constant 14 : i32
    %25 = vector.broadcast %c14_i32 : i32 to vector<1x256xi32>
    %26 = arith.cmpi sle, %20, %25 : vector<1x256xi32>
    %27 = arith.extui %26 : vector<1x256xi1> to vector<1x256xi32>
    %28 = arith.sitofp %27 : vector<1x256xi32> to vector<1x256xf32>
    %c0_7 = arith.constant 0 : index
    %c0_8 = arith.constant 0 : index
    %c0_9 = arith.constant 0 : index
    %29 = vector.load %arg1[%c0_7, %c0_8, %c0_9] : memref<1x4x256xf32, #tpu.memory_space<vmem>>, vector<1x4x256xf32>
    %30 = vector.shape_cast %29 : vector<1x4x256xf32> to vector<4x256xf32>
    %c0_10 = arith.constant 0 : index
    %c128 = arith.constant 128 : index
    %31 = vector.load %arg4[%c0_10, %c128] : memref<4x401xf32, #tpu.memory_space<vmem>>, vector<4x256xf32>
    tpu.vector_store %arg4[%c0_10, %c128], %30 {strides = array<i32>} : memref<4x401xf32, #tpu.memory_space<vmem>>, vector<4x256xf32>,
    %c0_11 = arith.constant 0 : index
    %c111 = arith.constant 111 : index
    %32 = vector.load %arg4[%c0_11, %c111] : memref<4x401xf32, #tpu.memory_space<vmem>>, vector<4x256xf32>
    %c0_12 = arith.constant 0 : index
    %c0_13 = arith.constant 0 : index
    %c0_14 = arith.constant 0 : index
    %33 = vector.load %arg2[%c0_12, %c0_13, %c0_14] : memref<18x4x4xf32, #tpu.memory_space<vmem>>, vector<1x4x4xf32>
    %34 = vector.shape_cast %33 : vector<1x4x4xf32> to vector<4x4xf32>
    %cst_15 = arith.constant dense<0.000000e+00> : vector<4x256xf32>
    %35 = tpu.matmul %34, %32, %cst_15 {dimension_numbers = #tpu.dot_dimension_numbers<[1], [0], [0], [1], [0, 0, 1, 1], [], []>} : vector<4x4xf32>, vector<4x256xf32>, vector<4x256xf32> -> vector<4x256xf32>
    %c0_16 = arith.constant 0 : index
    %c112 = arith.constant 112 : index
    %36 = vector.load %arg4[%c0_16, %c112] : memref<4x401xf32, #tpu.memory_space<vmem>>, vector<4x256xf32>
    %c1 = arith.constant 1 : index
    %c0_17 = arith.constant 0 : index
    %c0_18 = arith.constant 0 : index
    %37 = vector.load %arg2[%c1, %c0_17, %c0_18] : memref<18x4x4xf32, #tpu.memory_space<vmem>>, vector<1x4x4xf32>
    %38 = vector.shape_cast %37 : vector<1x4x4xf32> to vector<4x4xf32>
    %cst_19 = arith.constant dense<0.000000e+00> : vector<4x256xf32>
    %39 = tpu.matmul %38, %36, %cst_19 {dimension_numbers = #tpu.dot_dimension_numbers<[1], [0], [0], [1], [0, 0, 1, 1], [], []>} : vector<4x4xf32>, vector<4x256xf32>, vector<4x256xf32> -> vector<4x256xf32>
    %c0_20 = arith.constant 0 : index
    %c113 = arith.constant 113 : index
    %40 = vector.load %arg4[%c0_20, %c113] : memref<4x401xf32, #tpu.memory_space<vmem>>, vector<4x256xf32>
    %c2 = arith.constant 2 : index
    %c0_21 = arith.constant 0 : index
    %c0_22 = arith.constant 0 : index
    %41 = vector.load %arg2[%c2, %c0_21, %c0_22] : memref<18x4x4xf32, #tpu.memory_space<vmem>>, vector<1x4x4xf32>
    %42 = vector.shape_cast %41 : vector<1x4x4xf32> to vector<4x4xf32>
    %cst_23 = arith.constant dense<0.000000e+00> : vector<4x256xf32>
    %43 = tpu.matmul %42, %40, %cst_23 {dimension_numbers = #tpu.dot_dimension_numbers<[1], [0], [0], [1], [0, 0, 1, 1], [], []>} : vector<4x4xf32>, vector<4x256xf32>, vector<4x256xf32> -> vector<4x256xf32>
    %c0_24 = arith.constant 0 : index
    %c127 = arith.constant 127 : index
    %44 = vector.load %arg4[%c0_24, %c127] : memref<4x401xf32, #tpu.memory_space<vmem>>, vector<4x256xf32>
    %c3 = arith.constant 3 : index
    %c0_25 = arith.constant 0 : index
    %c0_26 = arith.constant 0 : index
    %45 = vector.load %arg2[%c3, %c0_25, %c0_26] : memref<18x4x4xf32, #tpu.memory_space<vmem>>, vector<1x4x4xf32>
    %46 = vector.shape_cast %45 : vector<1x4x4xf32> to vector<4x4xf32>
    %cst_27 = arith.constant dense<0.000000e+00> : vector<4x256xf32>
    %47 = tpu.matmul %46, %44, %cst_27 {dimension_numbers = #tpu.dot_dimension_numbers<[1], [0], [0], [1], [0, 0, 1, 1], [], []>} : vector<4x4xf32>, vector<4x256xf32>, vector<4x256xf32> -> vector<4x256xf32>
    %48 = arith.addf %35, %47 : vector<4x256xf32>
    %c0_28 = arith.constant 0 : index
    %c128_29 = arith.constant 128 : index
    %49 = vector.load %arg4[%c0_28, %c128_29] : memref<4x401xf32, #tpu.memory_space<vmem>>, vector<4x256xf32>
    %c4 = arith.constant 4 : index
    %c0_30 = arith.constant 0 : index
    %c0_31 = arith.constant 0 : index
    %50 = vector.load %arg2[%c4, %c0_30, %c0_31] : memref<18x4x4xf32, #tpu.memory_space<vmem>>, vector<1x4x4xf32>
    %51 = vector.shape_cast %50 : vector<1x4x4xf32> to vector<4x4xf32>
    %cst_32 = arith.constant dense<0.000000e+00> : vector<4x256xf32>
    %52 = tpu.matmul %51, %49, %cst_32 {dimension_numbers = #tpu.dot_dimension_numbers<[1], [0], [0], [1], [0, 0, 1, 1], [], []>} : vector<4x4xf32>, vector<4x256xf32>, vector<4x256xf32> -> vector<4x256xf32>
    %53 = arith.addf %39, %52 : vector<4x256xf32>
    %c0_33 = arith.constant 0 : index
    %c129 = arith.constant 129 : index
    %54 = vector.load %arg4[%c0_33, %c129] : memref<4x401xf32, #tpu.memory_space<vmem>>, vector<4x256xf32>
    %c5 = arith.constant 5 : index
    %c0_34 = arith.constant 0 : index
    %c0_35 = arith.constant 0 : index
    %55 = vector.load %arg2[%c5, %c0_34, %c0_35] : memref<18x4x4xf32, #tpu.memory_space<vmem>>, vector<1x4x4xf32>
    %56 = vector.shape_cast %55 : vector<1x4x4xf32> to vector<4x4xf32>
    %cst_36 = arith.constant dense<0.000000e+00> : vector<4x256xf32>
    %57 = tpu.matmul %56, %54, %cst_36 {dimension_numbers = #tpu.dot_dimension_numbers<[1], [0], [0], [1], [0, 0, 1, 1], [], []>} : vector<4x4xf32>, vector<4x256xf32>, vector<4x256xf32> -> vector<4x256xf32>
    %58 = arith.addf %43, %57 : vector<4x256xf32>
    %c0_37 = arith.constant 0 : index
    %c143 = arith.constant 143 : index
    %59 = vector.load %arg4[%c0_37, %c143] : memref<4x401xf32, #tpu.memory_space<vmem>>, vector<4x256xf32>
    %c6 = arith.constant 6 : index
    %c0_38 = arith.constant 0 : index
    %c0_39 = arith.constant 0 : index
    %60 = vector.load %arg2[%c6, %c0_38, %c0_39] : memref<18x4x4xf32, #tpu.memory_space<vmem>>, vector<1x4x4xf32>
    %61 = vector.shape_cast %60 : vector<1x4x4xf32> to vector<4x4xf32>
    %cst_40 = arith.constant dense<0.000000e+00> : vector<4x256xf32>
    %62 = tpu.matmul %61, %59, %cst_40 {dimension_numbers = #tpu.dot_dimension_numbers<[1], [0], [0], [1], [0, 0, 1, 1], [], []>} : vector<4x4xf32>, vector<4x256xf32>, vector<4x256xf32> -> vector<4x256xf32>
    %63 = arith.addf %48, %62 : vector<4x256xf32>
    %c0_41 = arith.constant 0 : index
    %c144 = arith.constant 144 : index
    %64 = vector.load %arg4[%c0_41, %c144] : memref<4x401xf32, #tpu.memory_space<vmem>>, vector<4x256xf32>
    %c7 = arith.constant 7 : index
    %c0_42 = arith.constant 0 : index
    %c0_43 = arith.constant 0 : index
    %65 = vector.load %arg2[%c7, %c0_42, %c0_43] : memref<18x4x4xf32, #tpu.memory_space<vmem>>, vector<1x4x4xf32>
    %66 = vector.shape_cast %65 : vector<1x4x4xf32> to vector<4x4xf32>
    %cst_44 = arith.constant dense<0.000000e+00> : vector<4x256xf32>
    %67 = tpu.matmul %66, %64, %cst_44 {dimension_numbers = #tpu.dot_dimension_numbers<[1], [0], [0], [1], [0, 0, 1, 1], [], []>} : vector<4x4xf32>, vector<4x256xf32>, vector<4x256xf32> -> vector<4x256xf32>
    %68 = arith.addf %53, %67 : vector<4x256xf32>
    %c0_45 = arith.constant 0 : index
    %c145 = arith.constant 145 : index
    %69 = vector.load %arg4[%c0_45, %c145] : memref<4x401xf32, #tpu.memory_space<vmem>>, vector<4x256xf32>
    %c8 = arith.constant 8 : index
    %c0_46 = arith.constant 0 : index
    %c0_47 = arith.constant 0 : index
    %70 = vector.load %arg2[%c8, %c0_46, %c0_47] : memref<18x4x4xf32, #tpu.memory_space<vmem>>, vector<1x4x4xf32>
    %71 = vector.shape_cast %70 : vector<1x4x4xf32> to vector<4x4xf32>
    %cst_48 = arith.constant dense<0.000000e+00> : vector<4x256xf32>
    %72 = tpu.matmul %71, %69, %cst_48 {dimension_numbers = #tpu.dot_dimension_numbers<[1], [0], [0], [1], [0, 0, 1, 1], [], []>} : vector<4x4xf32>, vector<4x256xf32>, vector<4x256xf32> -> vector<4x256xf32>
    %73 = arith.addf %58, %72 : vector<4x256xf32>
    %74 = vector.broadcast %24 : vector<1x256xf32> to vector<4x256xf32>
    %75 = arith.mulf %74, %63 : vector<4x256xf32>
    %76 = arith.addf %68, %75 : vector<4x256xf32>
    %77 = vector.broadcast %28 : vector<1x256xf32> to vector<4x256xf32>
    %78 = arith.mulf %77, %73 : vector<4x256xf32>
    %79 = arith.addf %76, %78 : vector<4x256xf32>
    %c0_49 = arith.constant 0 : index
    %c128_50 = arith.constant 128 : index
    %80 = vector.load %arg4[%c0_49, %c128_50] : memref<4x401xf32, #tpu.memory_space<vmem>>, vector<4x256xf32>
    tpu.vector_store %arg4[%c0_49, %c128_50], %79 {strides = array<i32>} : memref<4x401xf32, #tpu.memory_space<vmem>>, vector<4x256xf32>,
    %c0_51 = arith.constant 0 : index
    %c111_52 = arith.constant 111 : index
    %81 = vector.load %arg4[%c0_51, %c111_52] : memref<4x401xf32, #tpu.memory_space<vmem>>, vector<4x256xf32>
    %c9 = arith.constant 9 : index
    %c0_53 = arith.constant 0 : index
    %c0_54 = arith.constant 0 : index
    %82 = vector.load %arg2[%c9, %c0_53, %c0_54] : memref<18x4x4xf32, #tpu.memory_space<vmem>>, vector<1x4x4xf32>
    %83 = vector.shape_cast %82 : vector<1x4x4xf32> to vector<4x4xf32>
    %cst_55 = arith.constant dense<0.000000e+00> : vector<4x256xf32>
    %84 = tpu.matmul %83, %81, %cst_55 {dimension_numbers = #tpu.dot_dimension_numbers<[1], [0], [0], [1], [0, 0, 1, 1], [], []>} : vector<4x4xf32>, vector<4x256xf32>, vector<4x256xf32> -> vector<4x256xf32>
    %c0_56 = arith.constant 0 : index
    %c112_57 = arith.constant 112 : index
    %85 = vector.load %arg4[%c0_56, %c112_57] : memref<4x401xf32, #tpu.memory_space<vmem>>, vector<4x256xf32>
    %c10 = arith.constant 10 : index
    %c0_58 = arith.constant 0 : index
    %c0_59 = arith.constant 0 : index
    %86 = vector.load %arg2[%c10, %c0_58, %c0_59] : memref<18x4x4xf32, #tpu.memory_space<vmem>>, vector<1x4x4xf32>
    %87 = vector.shape_cast %86 : vector<1x4x4xf32> to vector<4x4xf32>
    %cst_60 = arith.constant dense<0.000000e+00> : vector<4x256xf32>
    %88 = tpu.matmul %87, %85, %cst_60 {dimension_numbers = #tpu.dot_dimension_numbers<[1], [0], [0], [1], [0, 0, 1, 1], [], []>} : vector<4x4xf32>, vector<4x256xf32>, vector<4x256xf32> -> vector<4x256xf32>
    %c0_61 = arith.constant 0 : index
    %c113_62 = arith.constant 113 : index
    %89 = vector.load %arg4[%c0_61, %c113_62] : memref<4x401xf32, #tpu.memory_space<vmem>>, vector<4x256xf32>
    %c11 = arith.constant 11 : index
    %c0_63 = arith.constant 0 : index
    %c0_64 = arith.constant 0 : index
    %90 = vector.load %arg2[%c11, %c0_63, %c0_64] : memref<18x4x4xf32, #tpu.memory_space<vmem>>, vector<1x4x4xf32>
    %91 = vector.shape_cast %90 : vector<1x4x4xf32> to vector<4x4xf32>
    %cst_65 = arith.constant dense<0.000000e+00> : vector<4x256xf32>
    %92 = tpu.matmul %91, %89, %cst_65 {dimension_numbers = #tpu.dot_dimension_numbers<[1], [0], [0], [1], [0, 0, 1, 1], [], []>} : vector<4x4xf32>, vector<4x256xf32>, vector<4x256xf32> -> vector<4x256xf32>
    %c0_66 = arith.constant 0 : index
    %c127_67 = arith.constant 127 : index
    %93 = vector.load %arg4[%c0_66, %c127_67] : memref<4x401xf32, #tpu.memory_space<vmem>>, vector<4x256xf32>
    %c12 = arith.constant 12 : index
    %c0_68 = arith.constant 0 : index
    %c0_69 = arith.constant 0 : index
    %94 = vector.load %arg2[%c12, %c0_68, %c0_69] : memref<18x4x4xf32, #tpu.memory_space<vmem>>, vector<1x4x4xf32>
    %95 = vector.shape_cast %94 : vector<1x4x4xf32> to vector<4x4xf32>
    %cst_70 = arith.constant dense<0.000000e+00> : vector<4x256xf32>
    %96 = tpu.matmul %95, %93, %cst_70 {dimension_numbers = #tpu.dot_dimension_numbers<[1], [0], [0], [1], [0, 0, 1, 1], [], []>} : vector<4x4xf32>, vector<4x256xf32>, vector<4x256xf32> -> vector<4x256xf32>
    %97 = arith.addf %84, %96 : vector<4x256xf32>
    %c0_71 = arith.constant 0 : index
    %c128_72 = arith.constant 128 : index
    %98 = vector.load %arg4[%c0_71, %c128_72] : memref<4x401xf32, #tpu.memory_space<vmem>>, vector<4x256xf32>
    %c13 = arith.constant 13 : index
    %c0_73 = arith.constant 0 : index
    %c0_74 = arith.constant 0 : index
    %99 = vector.load %arg2[%c13, %c0_73, %c0_74] : memref<18x4x4xf32, #tpu.memory_space<vmem>>, vector<1x4x4xf32>
    %100 = vector.shape_cast %99 : vector<1x4x4xf32> to vector<4x4xf32>
    %cst_75 = arith.constant dense<0.000000e+00> : vector<4x256xf32>
    %101 = tpu.matmul %100, %98, %cst_75 {dimension_numbers = #tpu.dot_dimension_numbers<[1], [0], [0], [1], [0, 0, 1, 1], [], []>} : vector<4x4xf32>, vector<4x256xf32>, vector<4x256xf32> -> vector<4x256xf32>
    %102 = arith.addf %88, %101 : vector<4x256xf32>
    %c0_76 = arith.constant 0 : index
    %c129_77 = arith.constant 129 : index
    %103 = vector.load %arg4[%c0_76, %c129_77] : memref<4x401xf32, #tpu.memory_space<vmem>>, vector<4x256xf32>
    %c14 = arith.constant 14 : index
    %c0_78 = arith.constant 0 : index
    %c0_79 = arith.constant 0 : index
    %104 = vector.load %arg2[%c14, %c0_78, %c0_79] : memref<18x4x4xf32, #tpu.memory_space<vmem>>, vector<1x4x4xf32>
    %105 = vector.shape_cast %104 : vector<1x4x4xf32> to vector<4x4xf32>
    %cst_80 = arith.constant dense<0.000000e+00> : vector<4x256xf32>
    %106 = tpu.matmul %105, %103, %cst_80 {dimension_numbers = #tpu.dot_dimension_numbers<[1], [0], [0], [1], [0, 0, 1, 1], [], []>} : vector<4x4xf32>, vector<4x256xf32>, vector<4x256xf32> -> vector<4x256xf32>
    %107 = arith.addf %92, %106 : vector<4x256xf32>
    %c0_81 = arith.constant 0 : index
    %c143_82 = arith.constant 143 : index
    %108 = vector.load %arg4[%c0_81, %c143_82] : memref<4x401xf32, #tpu.memory_space<vmem>>, vector<4x256xf32>
    %c15 = arith.constant 15 : index
    %c0_83 = arith.constant 0 : index
    %c0_84 = arith.constant 0 : index
    %109 = vector.load %arg2[%c15, %c0_83, %c0_84] : memref<18x4x4xf32, #tpu.memory_space<vmem>>, vector<1x4x4xf32>
    %110 = vector.shape_cast %109 : vector<1x4x4xf32> to vector<4x4xf32>
    %cst_85 = arith.constant dense<0.000000e+00> : vector<4x256xf32>
    %111 = tpu.matmul %110, %108, %cst_85 {dimension_numbers = #tpu.dot_dimension_numbers<[1], [0], [0], [1], [0, 0, 1, 1], [], []>} : vector<4x4xf32>, vector<4x256xf32>, vector<4x256xf32> -> vector<4x256xf32>
    %112 = arith.addf %97, %111 : vector<4x256xf32>
    %c0_86 = arith.constant 0 : index
    %c144_87 = arith.constant 144 : index
    %113 = vector.load %arg4[%c0_86, %c144_87] : memref<4x401xf32, #tpu.memory_space<vmem>>, vector<4x256xf32>
    %c16 = arith.constant 16 : index
    %c0_88 = arith.constant 0 : index
    %c0_89 = arith.constant 0 : index
    %114 = vector.load %arg2[%c16, %c0_88, %c0_89] : memref<18x4x4xf32, #tpu.memory_space<vmem>>, vector<1x4x4xf32>
    %115 = vector.shape_cast %114 : vector<1x4x4xf32> to vector<4x4xf32>
    %cst_90 = arith.constant dense<0.000000e+00> : vector<4x256xf32>
    %116 = tpu.matmul %115, %113, %cst_90 {dimension_numbers = #tpu.dot_dimension_numbers<[1], [0], [0], [1], [0, 0, 1, 1], [], []>} : vector<4x4xf32>, vector<4x256xf32>, vector<4x256xf32> -> vector<4x256xf32>
    %117 = arith.addf %102, %116 : vector<4x256xf32>
    %c0_91 = arith.constant 0 : index
    %c145_92 = arith.constant 145 : index
    %118 = vector.load %arg4[%c0_91, %c145_92] : memref<4x401xf32, #tpu.memory_space<vmem>>, vector<4x256xf32>
    %c17 = arith.constant 17 : index
    %c0_93 = arith.constant 0 : index
    %c0_94 = arith.constant 0 : index
    %119 = vector.load %arg2[%c17, %c0_93, %c0_94] : memref<18x4x4xf32, #tpu.memory_space<vmem>>, vector<1x4x4xf32>
    %120 = vector.shape_cast %119 : vector<1x4x4xf32> to vector<4x4xf32>
    %cst_95 = arith.constant dense<0.000000e+00> : vector<4x256xf32>
    %121 = tpu.matmul %120, %118, %cst_95 {dimension_numbers = #tpu.dot_dimension_numbers<[1], [0], [0], [1], [0, 0, 1, 1], [], []>} : vector<4x4xf32>, vector<4x256xf32>, vector<4x256xf32> -> vector<4x256xf32>
    %122 = arith.addf %107, %121 : vector<4x256xf32>
    %123 = vector.broadcast %24 : vector<1x256xf32> to vector<4x256xf32>
    %124 = arith.mulf %123, %112 : vector<4x256xf32>
    %125 = arith.addf %117, %124 : vector<4x256xf32>
    %126 = vector.broadcast %28 : vector<1x256xf32> to vector<4x256xf32>
    %127 = arith.mulf %126, %122 : vector<4x256xf32>
    %128 = arith.addf %125, %127 : vector<4x256xf32>
    %c0_96 = arith.constant 0 : index
    %c0_97 = arith.constant 0 : index
    %c0_98 = arith.constant 0 : index
    %129 = vector.load %arg1[%c0_96, %c0_97, %c0_98] : memref<1x4x256xf32, #tpu.memory_space<vmem>>, vector<1x4x256xf32>
    %130 = vector.shape_cast %129 : vector<1x4x256xf32> to vector<4x256xf32>
    %131 = arith.addf %128, %130 : vector<4x256xf32>
    %cst_99 = arith.constant 0.000000e+00 : f32
    %132 = vector.broadcast %cst_99 : f32 to vector<4x256xf32>
    %133 = arith.maximumf %131, %132 : vector<4x256xf32>
    %c0_100 = arith.constant 0 : index
    %c0_101 = arith.constant 0 : index
    %c0_102 = arith.constant 0 : index
    %134 = vector.load %arg3[%c0_100, %c0_101, %c0_102] : memref<1x4x256xf32, #tpu.memory_space<vmem>>, vector<1x4x256xf32>
    %135 = vector.shape_cast %134 : vector<1x4x256xf32> to vector<4x256xf32>
    %136 = vector.shape_cast %133 : vector<4x256xf32> to vector<1x4x256xf32>
    tpu.vector_store %arg3[%c0_100, %c0_101, %c0_102], %136 {strides = array<i32>} : memref<1x4x256xf32, #tpu.memory_space<vmem>>, vector<1x4x256xf32>,
    return
  }
  func.func @transform_0(%arg0: i32) -> (i32, i32, i32) {
    %c0_i32 = arith.constant 0 : i32
    %c0_i32_0 = arith.constant 0 : i32
    %c0_i32_1 = arith.constant 0 : i32
    return %arg0, %c0_i32, %c0_i32_0 : i32, i32, i32
  }
  func.func @transform_1(%arg0: i32) -> (i32, i32, i32) {
    %c0_i32 = arith.constant 0 : i32
    %c0_i32_0 = arith.constant 0 : i32
    %c0_i32_1 = arith.constant 0 : i32
    %c0_i32_2 = arith.constant 0 : i32
    return %c0_i32, %c0_i32_0, %c0_i32_1 : i32, i32, i32
  }
  func.func @transform_2(%arg0: i32) -> (i32, i32, i32) {
    %c0_i32 = arith.constant 0 : i32
    %c0_i32_0 = arith.constant 0 : i32
    %c0_i32_1 = arith.constant 0 : i32
    return %arg0, %c0_i32, %c0_i32_0 : i32, i32, i32
  }
}

</mosaic_0001>

<bundles_post_ra>
// kernel: tpu_custom_call.1
= control target key start
LH: loop header
LB: loop body
LE: loop exit
PB: predicated region body
PF: predicated region fallthrough
CT: control target
= control target key end

     0   :  { %7 = vsyncpa [#allocation4], 0  ;;  %s2501_s0 = inlined_call_operand.vmem [shape: f32[2,4,256], index: 0, kind: input, shape index: {}]   ;;  %s2502_s1 = inlined_call_operand.vmem [shape: f32[18,4,4], index: 1, kind: input, shape index: {}]   ;;  %s2503_s2 = inlined_call_operand.hbm [shape: f32[2,4,256], index: 2, kind: output, shape index: {}]  }
   0x1   :  { %9 = vsyncpa [#allocation4 + $0x1], 0  ;;  %s2167_s9 = smov 0   ;;  %s2169_s10 = smov 0  }
   0x2   :  { %s2171_s11 = smov 0   ;;  %s2173_s12 = smov 0  }
   0x3 LB: > { %s2188_s13 = sadd.s32 4294967295, %s2140_s12   ;;  %s1939_s14 = sadd.s32 4294967294, %s2140_s12   ;;  %s2140_s12 = sphi %s2173_s12, %s2509_s12   ;;  %s2136_s11 = sphi %s2171_s11, %s2508_s11   ;;  %s2132_s10 = sphi %s2169_s10, %s2507_s10   ;;  %s2128_s9 = sphi %s2167_s9, %s2506_s9  }
   0x4   : > { %s2192_s15 = sadd.s32 1, %s2140_s12   ;;  %s69_s16 = sadd.s32 1, %s2136_s11 }
   0x5   : > { %s66_s17 = ssub.s32 %s2140_s12, %s2192_s15  ;;  %p79_p0 = scmp.ne.s32.totalorder %s2136_s11, %s2132_s10 }
   0x6   : > { %p67_p1 = scmp.eq.s32.totalorder %s66_s17, 0  ;;  %p80_p2 = scmp.eq.s32.totalorder %s2188_s13, 1 }
   0x7   : > { %p85_p3 = scmp.ne.s32.totalorder %s2132_s10, %s2128_s9  ;;  %p86_p4 = scmp.eq.s32.totalorder %s1939_s14, 1 }
   0x8   : > { %s2203_s18 = scalar_select %p67_p1, %s2136_s11, %s69_s16  }
   0x9   : > { %p2205_p5 = por %p80_p2, %p79_p0  ;;  %p2209_p6 = por %p86_p4, %p85_p3 }
   0xa   : > { %p1942_p7 = scmp.ge.s32.totalorder %s2140_s12, 1  ;;  %p115_p8 = scmp.lt.s32.totalorder %s2140_s12, 3 }
   0xc   : > { %p116_p9 = pnand %p1942_p7, %p115_p8 }
   0xd   : > { %p137_p10 = scmp.lt.s32.totalorder (!%p116_p9), %s2188_s13, 1  ;;  %s2143_s26 = smov (!%p116_p9), 127  }
   0xe   : > { %119 = sbr.rel (%p116_p9) target bundleno = 785 (0x311), region = 28  ;;  %s2144_s27 = smov (!%p116_p9), 1  }
   0xf   : > { %s2145_s28 = smov (!%p116_p9), 17   ;;  %s2146_s29 = smov (!%p116_p9), 16  }
  0x10   : > { %s2147_s30 = smov (!%p116_p9), 15   ;;  %s2148_s3 = smov (!%p116_p9), 113  }
  0x11   : > { %s2149_s4 = smov (!%p116_p9), 112   ;;  %s2150_s5 = smov (!%p116_p9), 111  }
  0x12   : > { %s2151_s23 = smov (!%p116_p9), [#allocation3]  }
  0x13   : > { %vm143_vm0 = vcmask 134144   ;;  %v2142_v0 = vmov 0.0   ;;  %s138_s21 = scalar_select %p137_p10, %s2188_s13, 1  ;;  %vm204_vm1 = vcmask 7168   ;;  %vm211_vm2 = vcmask 1043456  }
  0x14   : > { %144 = vst.msk [vmem:[#allocation2 + $0xc] sm:$0xf] %vm143_vm0, %v2142_v0  ;;  %142 = vst [vmem:[#allocation2] sm:$0xf] %v2142_v0  ;;  %280 = vmatprep.mubr.f32.mxu0 %v2142_v0  ;;  %367 = vmatprep.mubr.f32.mxu1 %v2142_v0  ;;  %v1952_v19 = vld [vmem:[%s2502_s1 + $0xc] sm:$0xf] }
  0x15   : > { %s2026_s22 = sshll.u32 %s138_s21, 3  ;;  %vm207_vm3 = vcmask 31744   ;;  %vm293_vm4 = vcmask 138240   ;;  %vm463_vm5 = vcmask 130048   ;;  %v1959_v24 = vld [vmem:[%s2502_s1 + $0x10] sm:$0xf] }
  0x16   : > { %s141_s25 = scalar_lea.vmem %s2501_s0, %s2026_s22  ;;  %vm557_vm6 = vcmask 1039360   ;;  %v188_v25 = vld [vmem:[%s2502_s1] sm:$0xf]  ;;  %v1966_v31 = vld [vmem:[%s2502_s1 + $0x14] sm:$0xf]  ;;  %vm644_vm7 = vcmask 121856  }
  0x17   : > { %v2224_v1 = vld [vmem:[%s141_s25] sm:$0xff]  ;;  %vm738_vm8 = vcmask 924672   ;;  %v1973_v43 = vld [vmem:[%s2502_s1 + $0x18] sm:$0xf]  ;;  %v1951_v46 = vld [vmem:[%s2502_s1 + $0x8] sm:$0xf] }
  0x18   : > { %185 = vst [vmem:[#allocation2 + $0x4] sm:$0xff] %v2224_v1  ;;  %v2238_v6 = vcombine.high %v2224_v1, %v2224_v1  ;;  %v1950_v34 = vld [vmem:[%s2502_s1 + $0x4] sm:$0xf]  ;;  %vm834_vm9 = vcmask 916480   ;;  %vm930_vm10 = vcmask 908288   ;;  %s134_s21 = sand.u32 1, %s2132_s10  }
  0x19   : > { %v1981_v55 = vld [vmem:[%s2502_s1 + $0x20] sm:$0xf]  ;;  %v1977_v57 = vld [vmem:[%s2502_s1 + $0x1c] sm:$0xf]  ;;  %s2084_s24 = sshll.u32 %s2151_s23, 4  ;;  %s2085_s24 = int_to_ptr.vmem [resolvable:$false] %s2084_s24 }
  0x1b   : > { %v545_v2 = vld [vmem:[#allocation2 + $0xc] sm:$0xf] }
  0x1c   : > { %555 = vrot.lane.b32.xlu1 %v545_v2, %s2143_s26  ;;  %v726_v7 = vld [vmem:[#allocation2 + $0xc] sm:$0xf] }
  0x1d   : > { %v822_v8 = vld [vmem:[#allocation2 + $0xc] sm:$0xf] }
  0x1e   : > { %v918_v9 = vld [vmem:[#allocation2 + $0xc] sm:$0xf] }
  0x1f   : > { %v187_v3 = vld [vmem:[#allocation2 + $0x8] sm:$0xf]  ;;  %v186_v4 = vld [vmem:[#allocation2] sm:$0xff]  ;;  %v1381_v59 = vld [vmem:[#allocation2 + $0xc] sm:$0xf] }
  0x20   : > { %202 = vrot.lane.b32.xlu0 %v187_v3, %s2144_s27  ;;  %198 = vrot.lane.b32.xlu1 %v186_v4, %s2144_s27  ;;  %v197_v5 = vcombine.high %v186_v4, %v186_v4  ;;  %v1560_v60 = vld [vmem:[#allocation2 + $0xc] sm:$0xf] }
  0x24   : > { %291 = vrot.lane.b32.xlu0 %v187_v3, %s2145_s28  ;;  %287 = vrot.lane.b32.xlu1 %v186_v4, %s2145_s28 }
  0x28   : > { %461 = vrot.lane.b32.xlu1 %v187_v3, %s2146_s29  ;;  %200 = vrot.lane.b32.xlu0 %v197_v5, %s2144_s27 }
  0x2c   : > { %289 = vrot.lane.b32.xlu1 %v197_v5, %s2145_s28  ;;  %459 = vrot.lane.b32.xlu0 %v197_v5, %s2146_s29 }
  0x30   : > { %551 = vrot.lane.b32.xlu1 %v2224_v1, %s2143_s26  ;;  %553 = vrot.lane.b32.xlu0 %v2238_v6, %s2143_s26 }
  0x34   : > { %642 = vrot.lane.b32.xlu1 %v187_v3, %s2147_s30  ;;  %457 = vrot.lane.b32.xlu0 %v186_v4, %s2146_s29 }
  0x38   : > { %736 = vrot.lane.b32.xlu1 %v726_v7, %s2148_s3  ;;  %640 = vrot.lane.b32.xlu0 %v197_v5, %s2147_s30  ;;  %v145_v5 = vlaneseq }
  0x3c   : > { %732 = vrot.lane.b32.xlu1 %v2224_v1, %s2148_s3  ;;  %734 = vrot.lane.b32.xlu0 %v2238_v6, %s2148_s3 }
  0x40   : > { %832 = vrot.lane.b32.xlu1 %v822_v8, %s2149_s4  ;;  %638 = vrot.lane.b32.xlu0 %v186_v4, %s2147_s30 }
  0x44   : > { %928 = vrot.lane.b32.xlu1 %v918_v9, %s2150_s5  ;;  %830 = vrot.lane.b32.xlu0 %v2238_v6, %s2149_s4  ;;  %v146_v9 = vand.u32 127, %v145_v5 }
  0x48   : > { %924 = vrot.lane.b32.xlu1 %v2224_v1, %s2150_s5  ;;  %926 = vrot.lane.b32.xlu0 %v2238_v6, %s2150_s5 }
  0x4c   : > { %828 = vrot.lane.b32.xlu0 %v2224_v1, %s2149_s4  ;;  %1391 = vrot.lane.b32.xlu1 %v1381_v59, %s2143_s26 }
  0x50   : > { %1570 = vrot.lane.b32.xlu1 %v1560_v60, %s2148_s3 }
  0x8e   : > { %v556_v10 = vpop.permute.xlu1 %555 }
  0x92   : > { %v203_v11 = vpop.permute.xlu0 %202  ;;  %v199_v12 = vpop.permute.xlu1 %198 }
  0x96   : > { %v292_v13 = vpop.permute.xlu0 %291  ;;  %v288_v14 = vpop.permute.xlu1 %287 }
  0x9a   : > { %v462_v15 = vpop.permute.xlu1 %461  ;;  %v201_v16 = vpop.permute.xlu0 %200 }
  0x9b   : > { %v206_v17 = vsel %vm204_vm1, %v201_v16, %v203_v11  ;;  %v205_v18 = vsel %vm204_vm1, %v199_v12, %v201_v16  ;;  %v147_v12 = vadd.s32 128, %v146_v9 }
  0x9c   : > { %1953 = vmatprep.subr.msk.mxu0 %vm211_vm2, %v206_v17 }
  0x9d   : > { %1954 = vmatpush1.msk.msra.mxu0 %vm211_vm2, %v205_v18  ;;  %v159_v17 = vand.u32 15, %v147_v12  ;;  %v1985_v12 = vld [vmem:[%s2502_s1 + $0x24] sm:$0xf] }
  0x9e   : > { %v290_v20 = vpop.permute.xlu1 %289  ;;  %v460_v21 = vpop.permute.xlu0 %459  ;;  %1955 = vmatmul.mubr.msk.f32.vlgmr.msra.gmra.mxu0 %vm207_vm3, %v1952_v19  ;;  %1960 = vmatprep.subr.msk.mxu0 %vm211_vm2, %v2238_v6 }
  0x9f   : > { %v295_v22 = vsel %vm293_vm4, %v290_v20, %v292_v13  ;;  %v294_v23 = vsel %vm293_vm4, %v288_v14, %v290_v20  ;;  %1961 = vmatpush1.msk.msra.mxu0 %vm211_vm2, %v2224_v1  ;;  %450 = vmatprep.mubr.f32.mxu0 %v2142_v0  ;;  %v465_v26 = vsel %vm463_vm5, %v460_v21, %v462_v15  ;;  %v152_v13 = vand.u32 15, %v146_v9 }
  0xa0   : > { %1956 = vmatprep.subr.msk.mxu1 %vm211_vm2, %v295_v22  ;;  %vm173_vm12 = vcmp.ge.s32.totalorder %v159_v17, 1  ;;  %vm179_vm14 = vcmp.le.s32.totalorder %v159_v17, 14 }
  0xa1   : > { %1957 = vmatpush1.msk.msra.mxu1 %vm211_vm2, %v294_v23  ;;  %vm172_vm11 = vcmp.ge.s32.totalorder %v152_v13, 1  ;;  %vm178_vm13 = vcmp.le.s32.totalorder %v152_v13, 14  ;;  %v1995_v13 = vld [vmem:[%s2502_s1 + $0x34] sm:$0xf] }
  0xa2   : > { %v552_v27 = vpop.permute.xlu1 %551  ;;  %1963 = vmatprep.subr.msk.mxu1 %vm211_vm2, %v465_v26  ;;  %v554_v28 = vpop.permute.xlu0 %553  ;;  %1962 = vmatmul.mubr.msk.f32.vlgmr.msra.gmra.mxu0 %vm207_vm3, %v1959_v24  ;;  %v2347_v23 = vsel %vm172_vm11, 1.0, %v2142_v0 }
  0xa3   : > { %v558_v29 = vsel %vm557_vm6, %v552_v27, %v554_v28  ;;  %v559_v30 = vsel %vm557_vm6, %v554_v28, %v556_v10  ;;  %1958 = vmatmul.mubr.msk.f32.vlgmr.msra.gmra.mxu1 %vm207_vm3, %v188_v25  ;;  %631 = vmatprep.mubr.f32.mxu0 %v2142_v0 }
  0xa4   : > { %1967 = vmatprep.subr.msk.mxu0 %vm211_vm2, %v559_v30  ;;  %537 = vmatprep.mubr.f32.mxu1 %v2142_v0 }
  0xa5   : > { %1968 = vmatpush1.msk.msra.mxu0 %vm211_vm2, %v558_v29  ;;  %v2350_v29 = vsel %vm173_vm12, 1.0, %v2142_v0 }
  0xa6   : > { %v643_v32 = vpop.permute.xlu1 %642  ;;  %v458_v33 = vpop.permute.xlu0 %457  ;;  %1969 = vmatmul.mubr.msk.f32.vlgmr.msra.gmra.mxu0 %vm207_vm3, %v1966_v31 }
  0xa7   : > { %v464_v35 = vsel %vm463_vm5, %v458_v33, %v460_v21  ;;  %812 = vmatprep.mubr.f32.mxu0 %v2142_v0 }
  0xa8   : > { %1964 = vmatpush1.msk.msra.mxu1 %vm211_vm2, %v464_v35 }
  0xa9   : > { %1965 = vmatmul.mubr.msk.f32.vlgmr.msra.gmra.mxu1 %vm207_vm3, %v1950_v34 }
  0xaa   : > { %v737_v36 = vpop.permute.xlu1 %736  ;;  %v641_v37 = vpop.permute.xlu0 %640  ;;  %718 = vmatprep.mubr.f32.mxu1 %v2142_v0 }
  0xab   : > { %v646_v38 = vsel %vm644_vm7, %v641_v37, %v643_v32 }
  0xac   : > { %1970 = vmatprep.subr.msk.mxu1 %vm211_vm2, %v646_v38 }
  0xae   : > { %v733_v39 = vpop.permute.xlu1 %732  ;;  %v735_v40 = vpop.permute.xlu0 %734 }
  0xaf   : > { %v739_v41 = vsel %vm738_vm8, %v733_v39, %v735_v40  ;;  %v740_v42 = vsel %vm738_vm8, %v735_v40, %v737_v36  ;;  %v2354_v36 = vsel %vm178_vm13, 1.0, %v2142_v0 }
  0xb0   : > { %1974 = vmatprep.subr.msk.mxu0 %vm211_vm2, %v740_v42 }
  0xb1   : > { %1975 = vmatpush1.msk.msra.mxu0 %vm211_vm2, %v739_v41 }
  0xb2   : > { %v833_v44 = vpop.permute.xlu1 %832  ;;  %1976 = vmatmul.mubr.msk.f32.vlgmr.msra.gmra.mxu0 %vm207_vm3, %v1973_v43  ;;  %v639_v45 = vpop.permute.xlu0 %638 }
  0xb3   : > { %v645_v47 = vsel %vm644_vm7, %v639_v45, %v641_v37  ;;  %1004 = vmatprep.mubr.f32.mxu0 %v2142_v0  ;;  %v2357_v37 = vsel %vm179_vm14, 1.0, %v2142_v0 }
  0xb4   : > { %1971 = vmatpush1.msk.msra.mxu1 %vm211_vm2, %v645_v47 }
  0xb5   : > { %1972 = vmatmul.mubr.msk.f32.vlgmr.msra.gmra.mxu1 %vm207_vm3, %v1951_v46 }
  0xb6   : > { %v929_v48 = vpop.permute.xlu1 %928  ;;  %v831_v49 = vpop.permute.xlu0 %830  ;;  %908 = vmatprep.mubr.f32.mxu1 %v2142_v0 }
  0xb7   : > { %v836_v50 = vsel %vm834_vm9, %v831_v49, %v833_v44 }
  0xb8   : > { %1978 = vmatprep.subr.msk.mxu1 %vm211_vm2, %v836_v50 }
  0xba   : > { %v925_v51 = vpop.permute.xlu1 %924  ;;  %v927_v52 = vpop.permute.xlu0 %926 }
  0xbb   : > { %v931_v53 = vsel %vm930_vm10, %v925_v51, %v927_v52  ;;  %v932_v54 = vsel %vm930_vm10, %v927_v52, %v929_v48  ;;  %v1655_v52 = vld [vmem:[#allocation2 + $0xc] sm:$0xf] }
  0xbc   : > { %1982 = vmatprep.subr.msk.mxu0 %vm211_vm2, %v932_v54 }
  0xbd   : > { %1983 = vmatpush1.msk.msra.mxu0 %vm211_vm2, %v931_v53  ;;  %v1750_v53 = vld [vmem:[#allocation2 + $0xc] sm:$0xf] }
  0xbe   : > { %1984 = vmatmul.mubr.msk.f32.vlgmr.msra.gmra.mxu0 %vm207_vm3, %v1981_v55  ;;  %v829_v56 = vpop.permute.xlu0 %828  ;;  %v1392_v54 = vpop.permute.xlu1 %1391 }
  0xbf   : > { %v835_v58 = vsel %vm834_vm9, %v829_v56, %v831_v49  ;;  %1204 = vmatprep.mubr.f32.mxu0 %v2142_v0 }
  0xc0   : > { %1979 = vmatpush1.msk.msra.mxu1 %vm211_vm2, %v835_v58 }
  0xc1   : > { %1980 = vmatmul.mubr.msk.f32.vlgmr.msra.gmra.mxu1 %vm207_vm3, %v1977_v57 }
  0xc2   : > { %1118 = vmatprep.mubr.f32.mxu1 %v2142_v0  ;;  %v1571_v55 = vpop.permute.xlu1 %1570 }
 0x15e   : > { %v282_v61 = vpop.f32.mrf.mxu0 }
 0x160   : > { %v284_v62 = vpop.f32.mrf.mxu0 }
 0x162   : > { %v452_v63 = vpop.f32.mrf.mxu0 }
 0x163   : > { %v369_v2 = vpop.f32.mrf.mxu1 }
 0x164   : > { %v454_v3 = vpop.f32.mrf.mxu0  ;;  %v370_v16 = vadd.f32 %v369_v2, %v282_v61 }
 0x165   : > { %v371_v4 = vpop.f32.mrf.mxu1 }
 0x166   : > { %v633_v7 = vpop.f32.mrf.mxu0  ;;  %v372_v18 = vadd.f32 %v371_v4, %v284_v62 }
 0x168   : > { %v635_v10 = vpop.f32.mrf.mxu0 }
 0x169   : > { %v539_v8 = vpop.f32.mrf.mxu1 }
 0x16a   : > { %v540_v24 = vadd.f32 %v539_v8, %v452_v63 }
 0x16b   : > { %v541_v11 = vpop.f32.mrf.mxu1 }
 0x16c   : > { %v542_v30 = vadd.f32 %v541_v11, %v454_v3 }
 0x172   : > { %v814_v14 = vpop.f32.mrf.mxu0 }
 0x173   : > { %v819_v21 = vadd.f32 %v814_v14, %v370_v16 }
 0x174   : > { %v816_v19 = vpop.f32.mrf.mxu0 }
 0x175   : > { %v720_v15 = vpop.f32.mrf.mxu1  ;;  %v820_v25 = vadd.f32 %v816_v19, %v372_v18  ;;  %v1013_v32 = vmul.f32 %v2347_v23, %v819_v21  ;;  %v2002_v21 = vld [vmem:[%s2502_s1 + $0x38] sm:$0xf] }
 0x176   : > { %v721_v26 = vadd.f32 %v720_v15, %v633_v7  ;;  %v1988_v7 = vld [vmem:[%s2502_s1 + $0x30] sm:$0xf] }
 0x177   : > { %v722_v20 = vpop.f32.mrf.mxu1  ;;  %v1014_v39 = vmul.f32 %v2350_v29, %v820_v25 }
 0x178   : > { %v723_v27 = vadd.f32 %v722_v20, %v635_v10  ;;  %v1986_v20 = vld [vmem:[%s2502_s1 + $0x28] sm:$0xf] }
 0x17e   : > { %v1006_v22 = vpop.f32.mrf.mxu0 }
 0x17f   : > { %v1011_v33 = vadd.f32 %v1006_v22, %v721_v26 }
 0x180   : > { %v1008_v28 = vpop.f32.mrf.mxu0 }
 0x181   : > { %v910_v31 = vpop.f32.mrf.mxu1  ;;  %v1012_v34 = vadd.f32 %v1008_v28, %v723_v27  ;;  %v1017_v42 = vmul.f32 %v2354_v36, %v1011_v33  ;;  %v1987_v27 = vld [vmem:[%s2502_s1 + $0x2c] sm:$0xf] }
 0x182   : > { %v915_v35 = vadd.f32 %v910_v31, %v540_v24 }
 0x183   : > { %v912_v38 = vpop.f32.mrf.mxu1  ;;  %v1018_v43 = vmul.f32 %v2357_v37, %v1012_v34 }
 0x184   : > { %v1015_v40 = vadd.f32 %v1013_v32, %v915_v35  ;;  %v916_v41 = vadd.f32 %v912_v38, %v542_v30  ;;  %v2009_v32 = vld [vmem:[%s2502_s1 + $0x3c] sm:$0xf] }
 0x186   : > { %v1016_v44 = vadd.f32 %v1014_v39, %v916_v41  ;;  %v1019_v45 = vadd.f32 %v1017_v42, %v1015_v40  ;;  %v2017_v42 = vld [vmem:[%s2502_s1 + $0x44] sm:$0xf] }
 0x188   : > { %v1020_v46 = vadd.f32 %v1018_v43, %v1016_v44 }
 0x18a   : > { %v1023_v47 = vcombine.low %v1019_v45, %v1020_v46  ;;  %v2079_v51 = vcombine.low %v1020_v46, %v1020_v46 }
 0x18c   : > { %1025 = vst [vmem:[#allocation2 + $0x4] sm:$0xff] %v1023_v47 }
 0x193   : > { %v1027_v48 = vld [vmem:[#allocation2 + $0x8] sm:$0xf]  ;;  %v1026_v49 = vld [vmem:[#allocation2] sm:$0xff] }
 0x194   : > { %1043 = vrot.lane.b32.xlu1 %v1027_v48, %s2144_s27  ;;  %1039 = vrot.lane.b32.xlu0 %v1026_v49, %s2144_s27  ;;  %v1038_v50 = vcombine.high %v1026_v49, %v1026_v49 }
 0x198   : > { %1125 = vrot.lane.b32.xlu1 %v1026_v49, %s2145_s28  ;;  %1129 = vrot.lane.b32.xlu0 %v1027_v48, %s2145_s28 }
 0x19c   : > { %1298 = vrot.lane.b32.xlu1 %v1027_v48, %s2146_s29  ;;  %1294 = vrot.lane.b32.xlu0 %v1026_v49, %s2146_s29 }
 0x1a0   : > { %1387 = vrot.lane.b32.xlu1 %v1023_v47, %s2143_s26  ;;  %1473 = vrot.lane.b32.xlu0 %v1026_v49, %s2147_s30 }
 0x1a4   : > { %1477 = vrot.lane.b32.xlu1 %v1027_v48, %s2147_s30  ;;  %1041 = vrot.lane.b32.xlu0 %v1038_v50, %s2144_s27  ;;  %s2027_s27 = sshll.u32 %s2188_s13, 7  ;;  %s2086_s13 = scalar_lea.vmem %s2085_s24, 256 }
 0x1a8   : > { %1127 = vrot.lane.b32.xlu1 %v1038_v50, %s2145_s28  ;;  %1296 = vrot.lane.b32.xlu0 %v1038_v50, %s2146_s29 }
 0x1ac   : > { %1566 = vrot.lane.b32.xlu1 %v1023_v47, %s2148_s3  ;;  %1389 = vrot.lane.b32.xlu0 %v2079_v51, %s2143_s26  ;;  %s1943_s26 = sshll.u32 %s134_s21, 3 }
 0x1ad   : > { %s136_s28 = scalar_lea.vmem [#allocation3], %s1943_s26 }
 0x1ae   : > { %s1880_s29 = sshll.u32 %s136_s28, 4  ;;  %s1881_s29 = int_to_ptr.vmem [resolvable:$true] %s1880_s29 }
 0x1af   : > { %s2080_s22 = scalar_lea.vmem %s1881_s29, 128  ;;  %p2087_p0 = scmp.lt.s32.totalorder %s1881_s29, %s2085_s24 }
 0x1b0   : > { %1665 = vrot.lane.b32.xlu1 %v1655_v52, %s2149_s4  ;;  %1475 = vrot.lane.b32.xlu0 %v1038_v50, %s2147_s30  ;;  %p2081_p11 = scmp.ne.s32.totalorder %s1881_s29, %s2080_s22  ;;  %p2088_p1 = scmp.lt.s32.totalorder %s2086_s13, %s2080_s22 }
 0x1b2   : > { %p2082_p12 = pnand %p2081_p11, %p2205_p5  ;;  %p2089_p2 = por %p2088_p1, %p2087_p0 }
 0x1b4   : > { %1760 = vrot.lane.b32.xlu1 %v1750_v53, %s2150_s5  ;;  %1568 = vrot.lane.b32.xlu0 %v2079_v51, %s2148_s3  ;;  %p2083_p13 = pneg %p2082_p12 }
 0x1b6   : > { %p2090_p3 = pnand %p2089_p2, %p2083_p13 }
 0x1b8   : > { %1756 = vrot.lane.b32.xlu1 %v1023_v47, %s2150_s5  ;;  %1663 = vrot.lane.b32.xlu0 %v2079_v51, %s2149_s4 }
 0x1bc   : > { %1758 = vrot.lane.b32.xlu0 %v2079_v51, %s2150_s5  ;;  %s1866_s5 = scalar_lea.sflag [#allocation4], %s134_s21 }
 0x1c0   : > { %1661 = vrot.lane.b32.xlu0 %v1023_v47, %s2149_s4  ;;  %s1878_s4 = scalar_lea.hbm %s2503_s2, %s2027_s27 }
 0x206   : > { %v1044_v56 = vpop.permute.xlu1 %1043  ;;  %v1040_v57 = vpop.permute.xlu0 %1039 }
 0x20a   : > { %v1126_v58 = vpop.permute.xlu1 %1125  ;;  %v1130_v59 = vpop.permute.xlu0 %1129 }
 0x20e   : > { %v1299_v60 = vpop.permute.xlu1 %1298  ;;  %v1295_v61 = vpop.permute.xlu0 %1294 }
 0x212   : > { %v1388_v62 = vpop.permute.xlu1 %1387  ;;  %v1474_v63 = vpop.permute.xlu0 %1473 }
 0x216   : > { %v1478_v2 = vpop.permute.xlu1 %1477  ;;  %v1042_v3 = vpop.permute.xlu0 %1041 }
 0x217   : > { %v1045_v4 = vsel %vm204_vm1, %v1040_v57, %v1042_v3  ;;  %v1046_v5 = vsel %vm204_vm1, %v1042_v3, %v1044_v56 }
 0x218   : > { %1989 = vmatprep.subr.msk.mxu1 %vm211_vm2, %v1046_v5 }
 0x219   : > { %1990 = vmatpush1.msk.msra.mxu1 %vm211_vm2, %v1045_v4 }
 0x21a   : > { %v1128_v8 = vpop.permute.xlu1 %1127  ;;  %1996 = vmatprep.subr.msk.mxu1 %vm211_vm2, %v2079_v51  ;;  %v1297_v9 = vpop.permute.xlu0 %1296  ;;  %1991 = vmatmul.mubr.msk.f32.vlgmr.msra.gmra.mxu1 %vm207_vm3, %v1988_v7 }
 0x21b   : > { %v1131_v10 = vsel %vm293_vm4, %v1126_v58, %v1128_v8  ;;  %v1132_v11 = vsel %vm293_vm4, %v1128_v8, %v1130_v59  ;;  %1997 = vmatpush1.msk.msra.mxu1 %vm211_vm2, %v1023_v47  ;;  %1287 = vmatprep.mubr.f32.mxu1 %v2142_v0  ;;  %v1301_v14 = vsel %vm463_vm5, %v1297_v9, %v1299_v60 }
 0x21c   : > { %1992 = vmatprep.subr.msk.mxu0 %vm211_vm2, %v1132_v11  ;;  %v1300_v15 = vsel %vm463_vm5, %v1295_v61, %v1297_v9 }
 0x21d   : > { %1993 = vmatpush1.msk.msra.mxu0 %vm211_vm2, %v1131_v10 }
 0x21e   : > { %v1567_v16 = vpop.permute.xlu1 %1566  ;;  %1999 = vmatprep.subr.msk.mxu0 %vm211_vm2, %v1301_v14  ;;  %v1390_v17 = vpop.permute.xlu0 %1389  ;;  %1994 = vmatmul.mubr.msk.f32.vlgmr.msra.gmra.mxu0 %vm207_vm3, %v1985_v12 }
 0x21f   : > { %v1393_v18 = vsel %vm557_vm6, %v1388_v62, %v1390_v17  ;;  %v1394_v19 = vsel %vm557_vm6, %v1390_v17, %v1392_v54  ;;  %2000 = vmatpush1.msk.msra.mxu0 %vm211_vm2, %v1300_v15  ;;  %1998 = vmatmul.mubr.msk.f32.vlgmr.msra.gmra.mxu1 %vm207_vm3, %v1995_v13 }
 0x220   : > { %2003 = vmatprep.subr.msk.mxu1 %vm211_vm2, %v1394_v19  ;;  %1373 = vmatprep.mubr.f32.mxu0 %v2142_v0 }
 0x221   : > { %2004 = vmatpush1.msk.msra.mxu1 %vm211_vm2, %v1393_v18  ;;  %1466 = vmatprep.mubr.f32.mxu1 %v2142_v0 }
 0x222   : > { %v1666_v22 = vpop.permute.xlu1 %1665  ;;  %v1476_v24 = vpop.permute.xlu0 %1475  ;;  %2001 = vmatmul.mubr.msk.f32.vlgmr.msra.gmra.mxu0 %vm207_vm3, %v1986_v20 }
 0x223   : > { %v1479_v25 = vsel %vm644_vm7, %v1474_v63, %v1476_v24  ;;  %v1480_v26 = vsel %vm644_vm7, %v1476_v24, %v1478_v2  ;;  %2005 = vmatmul.mubr.msk.f32.vlgmr.msra.gmra.mxu1 %vm207_vm3, %v2002_v21  ;;  %1552 = vmatprep.mubr.f32.mxu0 %v2142_v0 }
 0x224   : > { %2006 = vmatprep.subr.msk.mxu0 %vm211_vm2, %v1480_v26  ;;  %1645 = vmatprep.mubr.f32.mxu1 %v2142_v0 }
 0x225   : > { %2007 = vmatpush1.msk.msra.mxu0 %vm211_vm2, %v1479_v25 }
 0x226   : > { %v1569_v28 = vpop.permute.xlu0 %1568  ;;  %2008 = vmatmul.mubr.msk.f32.vlgmr.msra.gmra.mxu0 %vm207_vm3, %v1987_v27  ;;  %v1761_v33 = vpop.permute.xlu1 %1760 }
 0x227   : > { %v1572_v30 = vsel %vm738_vm8, %v1567_v16, %v1569_v28  ;;  %v1573_v31 = vsel %vm738_vm8, %v1569_v28, %v1571_v55  ;;  %1740 = vmatprep.mubr.f32.mxu0 %v2142_v0 }
 0x228   : > { %2010 = vmatprep.subr.msk.mxu1 %vm211_vm2, %v1573_v31 }
 0x229   : > { %2011 = vmatpush1.msk.msra.mxu1 %vm211_vm2, %v1572_v30 }
 0x22a   : > { %2012 = vmatmul.mubr.msk.f32.vlgmr.msra.gmra.mxu1 %vm207_vm3, %v2009_v32  ;;  %v1664_v34 = vpop.permute.xlu0 %1663  ;;  %v1757_v38 = vpop.permute.xlu1 %1756 }
 0x22b   : > { %v1668_v35 = vsel %vm834_vm9, %v1664_v34, %v1666_v22  ;;  %1835 = vmatprep.mubr.f32.mxu1 %v2142_v0  ;;  %v2013_v0 = vld [vmem:[%s2502_s1 + $0x40] sm:$0xf] }
 0x22c   : > { %2014 = vmatprep.subr.msk.mxu0 %vm211_vm2, %v1668_v35 }
 0x22e   : > { %v1759_v39 = vpop.permute.xlu0 %1758 }
 0x22f   : > { %v1762_v40 = vsel %vm930_vm10, %v1757_v38, %v1759_v39  ;;  %v1763_v41 = vsel %vm930_vm10, %v1759_v39, %v1761_v33 }
 0x230   : > { %2018 = vmatprep.subr.msk.mxu1 %vm211_vm2, %v1763_v41 }
 0x231   : > { %2019 = vmatpush1.msk.msra.mxu1 %vm211_vm2, %v1762_v40 }
 0x232   : > { %2020 = vmatmul.mubr.msk.f32.vlgmr.msra.gmra.mxu1 %vm207_vm3, %v2017_v42  ;;  %v1662_v43 = vpop.permute.xlu0 %1661 }
 0x233   : > { %v1667_v44 = vsel %vm834_vm9, %v1662_v43, %v1664_v34 }
 0x234   : > { %2015 = vmatpush1.msk.msra.mxu0 %vm211_vm2, %v1667_v44 }
 0x235   : > { %2016 = vmatmul.mubr.msk.f32.vlgmr.msra.gmra.mxu0 %vm207_vm3, %v2013_v0 }
 0x2da   : > { %v1120_v45 = vpop.f32.mrf.mxu1 }
 0x2dc   : > { %v1122_v46 = vpop.f32.mrf.mxu1 }
 0x2de   : > { %v1206_v47 = vpop.f32.mrf.mxu0 }
 0x2df   : > { %v1289_v48 = vpop.f32.mrf.mxu1  ;;  %v1207_v57 = vadd.f32 %v1206_v47, %v1120_v45 }
 0x2e0   : > { %v1208_v50 = vpop.f32.mrf.mxu0 }
 0x2e1   : > { %v1291_v49 = vpop.f32.mrf.mxu1  ;;  %v1209_v60 = vadd.f32 %v1208_v50, %v1122_v46 }
 0x2e2   : > { %v1375_v52 = vpop.f32.mrf.mxu0 }
 0x2e3   : > { %v1468_v51 = vpop.f32.mrf.mxu1  ;;  %v1376_v2 = vadd.f32 %v1375_v52, %v1289_v48 }
 0x2e4   : > { %v1377_v54 = vpop.f32.mrf.mxu0 }
 0x2e5   : > { %v1470_v53 = vpop.f32.mrf.mxu1  ;;  %v1378_v10 = vadd.f32 %v1377_v54, %v1291_v49 }
 0x2e6   : > { %v1554_v56 = vpop.f32.mrf.mxu0 }
 0x2e7   : > { %v1555_v62 = vadd.f32 %v1554_v56, %v1468_v51 }
 0x2e8   : > { %v1556_v59 = vpop.f32.mrf.mxu0 }
 0x2e9   : > { %v1557_v4 = vadd.f32 %v1556_v59, %v1470_v53 }
 0x2ea   : > { %v1647_v55 = vpop.f32.mrf.mxu1 }
 0x2eb   : > { %v1652_v61 = vadd.f32 %v1647_v55, %v1207_v57 }
 0x2ec   : > { %v1649_v58 = vpop.f32.mrf.mxu1 }
 0x2ed   : > { %v1653_v3 = vadd.f32 %v1649_v58, %v1209_v60  ;;  %v1844_v9 = vmul.f32 %v2347_v23, %v1652_v61 }
 0x2ef   : > { %v1845_v14 = vmul.f32 %v2350_v29, %v1653_v3 }
 0x2f2   : > { %v1837_v63 = vpop.f32.mrf.mxu1 }
 0x2f3   : > { %v1842_v5 = vadd.f32 %v1837_v63, %v1555_v62 }
 0x2f4   : > { %v1839_v7 = vpop.f32.mrf.mxu1 }
 0x2f5   : > { %v1742_v8 = vpop.f32.mrf.mxu0  ;;  %v1843_v11 = vadd.f32 %v1839_v7, %v1557_v4  ;;  %v1848_v15 = vmul.f32 %v2354_v36, %v1842_v5 }
 0x2f6   : > { %v1747_v12 = vadd.f32 %v1742_v8, %v1376_v2 }
 0x2f7   : > { %v1744_v13 = vpop.f32.mrf.mxu0  ;;  %v1849_v18 = vmul.f32 %v2357_v37, %v1843_v11 }
 0x2f8   : > { %v1846_v16 = vadd.f32 %v1844_v9, %v1747_v12  ;;  %v1748_v17 = vadd.f32 %v1744_v13, %v1378_v10 }
 0x2fa   : > { %v1850_v19 = vadd.f32 %v1848_v15, %v1846_v16  ;;  %v1847_v20 = vadd.f32 %v1845_v14, %v1748_v17 }
 0x2fc   : > { %v1856_v23 = vadd.f32 %v1850_v19, %v2224_v1  ;;  %v1851_v21 = vadd.f32 %v1849_v18, %v1847_v20 }
 0x2fe   : > { %v1857_v22 = vadd.f32 %v1851_v21, %v2238_v6  ;;  %v1858_v24 = vmax.f32 %v1856_v23, 0.0 }
 0x300   : > { %v1859_v29 = vmax.f32 %v1857_v22, 0.0 }
 0x302   : > { %v1862_v25 = vcombine.low %v1858_v24, %v1859_v29 }
 0x304   : > { %1864 = vst [vmem:[%s136_s28] sm:$0xff] %v1862_v25 }
 0x305   : > { %2093 = shalt.err (!%p2090_p3)
}
 0x306   : > { %s2094_s25 = scalar_lea.hbm %s1878_s4, 128  ;;  %s2098_s8 = scalar_lea.hbm %s2503_s2, 256 }
 0x307   : > { %p2095_p4 = scmp.ne.s32.totalorder %s1878_s4, %s2094_s25  ;;  %p2099_p9 = scmp.lt.s32.totalorder %s1878_s4, %s2503_s2 }
 0x308   : > { %p2100_p10 = scmp.lt.s32.totalorder %s2098_s8, %s2094_s25 }
 0x309   : > { %p2096_p7 = pnand %p2095_p4, %p2205_p5 }
 0x30a   : > { %p2101_p11 = por %p2100_p10, %p2099_p9 }
 0x30b   : > { %p2097_p8 = pneg %p2096_p7 }
 0x30d   : > { %p2102_p12 = pnand %p2101_p11, %p2097_p8 }
 0x30f   : > { %2105 = shalt.err (!%p2102_p12)
}
 0x310   : > { %2028 = dma.vmem_to_hbm [thread:$0]  (%p2205_p5), %s1881_s29, 128, %s1878_s4, %s1866_s5  }
 0x311 PF: > { %p2034_p13 = scmp.ge.s32.totalorder %s2140_s12, 2  ;;  %s1892_s17 = sand.u32 1, %s2128_s9  }
 0x312   : > { %s1893_s21 = scalar_lea.sflag [#allocation4], %s1892_s17 }
 0x313   : > { %p2031_p0 = pnand %p2034_p13, %p2209_p6 }
 0x315   : > { %p2032_p1 = pneg %p2031_p0 }
 0x317   : > { %2123 = dma.done.wait (%p2032_p1), %s1893_s21, 128  }
 0x318   : > { %2125 = vsyncadd (%p2032_p1), %s1893_s21, 4294967168  ;;  %p12_p2 = scmp.ge.s32.totalorder %s2192_s15, 4   ;;  %s2506_s9 = smov %s2132_s10 }
 0x319   : > { %s2507_s10 = smov %s2136_s11  ;;  %s2508_s11 = smov %s2203_s18 }
 0x31a   : > { %s2509_s12 = smov %s2192_s15  ;;  %14 = sbr.rel (!%p12_p2) target bundleno = 3 (0x3), region = 80 }
 0x31f   :  { %1898 = vsyncpa [#allocation4], 1 }
 0x320   :  { %1900 = vsyncpa [#allocation4 + $0x1], 1 }

</bundles_post_ra>
